<compile_context>
chip_gen: v7x
topology: tpu7x:2x2x1
jax: 0.10.0
libtpu: 0.0.40
codegen_flags: <defaults>
</compile_context>

<pallas_src>
import functools

import jax
import jax.numpy as jnp
from jax.experimental import pallas as pl
from jax.experimental.pallas import tpu as pltpu

EPS = 1e-5  # PyTorch BatchNorm1d default eps


# --------------------------------------------------------------------------
# Kernel: 4 fused (matmul + bias) layers with ReLU and a residual add.
# Weights arrive BN-folded, bf16, pre-transposed as [in_features, out_features];
# biases arrive as (1, N) f32 slabs.  x arrives as raw f32.
# --------------------------------------------------------------------------
def _mlp_kernel(x_ref,
                w1_ref, b1_ref,
                w2_ref, b2_ref,
                w3_ref, b3_ref,
                w4_ref, b4_ref,
                o_ref):
    x = x_ref[...].astype(jnp.bfloat16)              # in-kernel bf16 cast

    # fc1 (+folded bn1) -> relu          (dropout = identity in eval)
    h1 = jnp.dot(x, w1_ref[...], preferred_element_type=jnp.float32) + b1_ref[...]
    h1_bf = jnp.maximum(h1, 0.0).astype(jnp.bfloat16)  # single live slab (tb, 256)

    # fc2 (+folded bn2) -> relu, residual add (bf16 residual copy)
    h2 = jnp.dot(h1_bf, w2_ref[...],
                 preferred_element_type=jnp.float32) + b2_ref[...]
    h2 = jnp.maximum(h2, 0.0) + h1_bf.astype(jnp.float32)   # f32 (tb, 256)

    # fc3 (+folded bn3) -> relu
    h3 = jnp.dot(h2.astype(jnp.bfloat16), w3_ref[...],
                 preferred_element_type=jnp.float32) + b3_ref[...]
    h3 = jnp.maximum(h3, 0.0)                                # f32 (tb, 128)

    # final linear (columns zero-padded to 128 lanes), bf16 writeback
    out = jnp.dot(h3.astype(jnp.bfloat16), w4_ref[...],
                  preferred_element_type=jnp.float32) + b4_ref[...]
    o_ref[...] = out.astype(o_ref.dtype)


# --------------------------------------------------------------------------
# Parameter prep (one-time, model-load path)
# --------------------------------------------------------------------------
def _round_up(n, m):
    return ((n + m - 1) // m) * m


def _fold_bn(w, b, bn):
    """Fold eval-mode BatchNorm1d into the preceding Linear (exact)."""
    gamma, beta, rmean, rvar = bn[0], bn[1], bn[2], bn[3]
    scale = gamma * jax.lax.rsqrt(rvar + EPS)            # (out,)
    return w * scale[None, :], b * scale + (beta - rmean * scale)


def prepare_params(params):
    """One-time constant prep: BN fold, pad final layer to 128 output lanes,
    cast weights to bf16, reshape biases to (1, N) f32.  Call once."""
    w1, b1 = _fold_bn(params["w1"], params["b1"], params["bn1"])
    w2, b2 = _fold_bn(params["w2"], params["b2"], params["bn2"])
    w3, b3 = _fold_bn(params["w3"], params["b3"], params["bn3"])
    w4, b4 = params["w4"], params["b4"]

    C = w4.shape[1]
    C_pad = _round_up(C, 128)
    if C_pad != C:
        w4 = jnp.pad(w4, ((0, 0), (0, C_pad - C)))
        b4 = jnp.pad(b4, ((0, C_pad - C),))

    def pack(w, b):
        return w.astype(jnp.bfloat16), b.astype(jnp.float32).reshape(1, -1)

    w1, b1 = pack(w1, b1)
    w2, b2 = pack(w2, b2)
    w3, b3 = pack(w3, b3)
    w4, b4 = pack(w4, b4)
    return dict(w1=w1, b1=b1, w2=w2, b2=b2, w3=w3, b3=b3, w4=w4, b4=b4)


# --------------------------------------------------------------------------
# Forward wrapper (jit this; num_classes/tb are Python constants)
# --------------------------------------------------------------------------
def embedding_classifier_bn(x, prep, *, num_classes, tb=1024):
    """x: [B, embedding_dim] float32; prep: output of prepare_params().
    Returns logits [B, num_classes] float32 (inference-mode forward)."""
    B, E = x.shape
    C_pad = prep["w4"].shape[1]

    # Batch tiling: no batch zero-padding (ragged last block is masked by
    # Pallas).  Force >= 2 (even) grid steps so the "parallel" batch axis
    # actually shards across the two TensorCores on v7x.
    n_steps = pl.cdiv(B, tb)
    n_steps = max(2, n_steps + (n_steps % 2))
    tb_eff = min(_round_up(pl.cdiv(B, n_steps), 8), _round_up(B, 8))
    grid = (pl.cdiv(B, tb_eff),)

    def batch_spec(d):
        return pl.BlockSpec((tb_eff, d), lambda i: (i, 0))

    def const_spec(shape):
        return pl.BlockSpec(shape, lambda i: (0,) * len(shape))

    rows = grid[0] * tb_eff     # rows actually computed (incl. masked tail)
    flops = 2 * rows * (E * 256 + 256 * 256 + 256 * 128 + 128 * C_pad)
    bytes_accessed = (
        B * E * 4 + B * C_pad * 2
        + sum(int(prep[k].size) * 2 for k in ("w1", "w2", "w3", "w4"))
        + sum(int(prep[k].size) * 4 for k in ("b1", "b2", "b3", "b4")))

    out = pl.pallas_call(
        _mlp_kernel,
        out_shape=jax.ShapeDtypeStruct((B, C_pad), jnp.bfloat16),
        grid_spec=pltpu.PrefetchScalarGridSpec(
            num_scalar_prefetch=0,
            grid=grid,
            in_specs=[
                batch_spec(E),
                const_spec(prep["w1"].shape), const_spec(prep["b1"].shape),
                const_spec(prep["w2"].shape), const_spec(prep["b2"].shape),
                const_spec(prep["w3"].shape), const_spec(prep["b3"].shape),
                const_spec(prep["w4"].shape), const_spec(prep["b4"].shape),
            ],
            out_specs=batch_spec(C_pad),
        ),
        compiler_params=pltpu.CompilerParams(
            dimension_semantics=("parallel",)),
        cost_estimate=pl.CostEstimate(
            flops=flops, transcendentals=0, bytes_accessed=bytes_accessed),
    )(x, prep["w1"], prep["b1"], prep["w2"], prep["b2"],
      prep["w3"], prep["b3"], prep["w4"], prep["b4"])

    # Slice away padded lanes and restore f32 logits (fuses under jit).
    return out[:, :num_classes].astype(jnp.float32)


# --------------------------------------------------------------------------
# Synthetic parameters matching the PyTorch module shapes.
# Linear weights stored transposed: [in_features, out_features].
# BN params stacked (4, C): gamma, beta, running_mean, running_var.
# --------------------------------------------------------------------------
def init_params(key, embedding_dim, num_classes):
    ks = jax.random.split(key, 11)

    def lin(kw, kb, fan_in, fan_out):
        w = jax.random.normal(kw, (fan_in, fan_out), jnp.float32) * 0.05
        b = jax.random.normal(kb, (fan_out,), jnp.float32) * 0.05
        return w, b

    def bn(k, c):
        kg, kb, km, kv = jax.random.split(k, 4)
        gamma = 1.0 + 0.1 * jax.random.normal(kg, (c,), jnp.float32)
        beta = 0.1 * jax.random.normal(kb, (c,), jnp.float32)
        rmean = 0.1 * jax.random.normal(km, (c,), jnp.float32)
        rvar = 0.5 + jax.random.uniform(kv, (c,), jnp.float32)
        return jnp.stack([gamma, beta, rmean, rvar], axis=0)

    w1, b1 = lin(ks[0], ks[1], embedding_dim, 256)
    w2, b2 = lin(ks[2], ks[3], 256, 256)
    w3, b3 = lin(ks[4], ks[5], 256, 128)
    w4, b4 = lin(ks[6], ks[7], 128, num_classes)
    return dict(
        w1=w1, b1=b1, bn1=bn(ks[8], 256),
        w2=w2, b2=b2, bn2=bn(ks[9], 256),
        w3=w3, b3=b3, bn3=bn(ks[10], 128),
        w4=w4, b4=b4,
    )


# Pure-JAX f32 reference with the original (unfolded) BN math.
def reference_forward(x, p):
    def bn_relu(h, q):
        scale = q[0] / jnp.sqrt(q[3] + EPS)
        return jnp.maximum(h * scale + (q[1] - q[2] * scale), 0.0)
    h1 = bn_relu(x @ p["w1"] + p["b1"], p["bn1"])
    h2 = bn_relu(h1 @ p["w2"] + p["b2"], p["bn2"]) + h1
    h3 = bn_relu(h2 @ p["w3"] + p["b3"], p["bn3"])
    return h3 @ p["w4"] + p["b4"]


if __name__ == "__main__":
    embedding_dim = 64
    num_classes = 10
    batch = 13   # not a multiple of the tile -> exercises the masked last block

    key = jax.random.PRNGKey(0)
    kx, kp = jax.random.split(key)
    x = jax.random.normal(kx, (batch, embedding_dim), jnp.float32)
    params = init_params(kp, embedding_dim, num_classes)

    prepared = prepare_params(params)               # one-time constant prep
    forward = jax.jit(functools.partial(embedding_classifier_bn,
                                        num_classes=num_classes))
    out = jax.block_until_ready(forward(x, prepared))

    ref = reference_forward(x, params)
    assert out.shape == (batch, num_classes)
    # bf16 matmul operands / bf16 output with f32 accumulation: small bounded error.
    assert jnp.allclose(out, ref, atol=3e-2, rtol=3e-2), "mismatch vs reference"
    print("KERNEL_OK")
</pallas_src>

<mosaic_0001>
module attributes {stable_mosaic.version = 11 : i64} {
  func.func @_mlp_kernel(%arg0: i32, %arg1: memref<8x64xf32, #tpu.memory_space<vmem>>, %arg2: memref<64x256xbf16, #tpu.memory_space<vmem>>, %arg3: memref<1x256xf32, #tpu.memory_space<vmem>>, %arg4: memref<256x256xbf16, #tpu.memory_space<vmem>>, %arg5: memref<1x256xf32, #tpu.memory_space<vmem>>, %arg6: memref<256x128xbf16, #tpu.memory_space<vmem>>, %arg7: memref<1x128xf32, #tpu.memory_space<vmem>>, %arg8: memref<128x128xbf16, #tpu.memory_space<vmem>>, %arg9: memref<1x128xf32, #tpu.memory_space<vmem>>, %arg10: memref<8x128xbf16, #tpu.memory_space<vmem>>) attributes {dimension_semantics = [#tpu.dimension_semantics<parallel>], iteration_bounds = array<i64: 2>, scalar_prefetch = 0 : i64, scratch_operands = 0 : i64, tpu.core_type = #tpu.core_type<tc>, window_params = [{transform_indices = @transform_0, window_bounds = array<i64: 8, 64>}, {pipeline_mode = #tpu.pipeline_mode<synchronous>, transform_indices = @transform_1, window_bounds = array<i64: 64, 256>}, {pipeline_mode = #tpu.pipeline_mode<synchronous>, transform_indices = @transform_2, window_bounds = array<i64: 1, 256>}, {pipeline_mode = #tpu.pipeline_mode<synchronous>, transform_indices = @transform_3, window_bounds = array<i64: 256, 256>}, {pipeline_mode = #tpu.pipeline_mode<synchronous>, transform_indices = @transform_4, window_bounds = array<i64: 1, 256>}, {pipeline_mode = #tpu.pipeline_mode<synchronous>, transform_indices = @transform_5, window_bounds = array<i64: 256, 128>}, {pipeline_mode = #tpu.pipeline_mode<synchronous>, transform_indices = @transform_6, window_bounds = array<i64: 1, 128>}, {pipeline_mode = #tpu.pipeline_mode<synchronous>, transform_indices = @transform_7, window_bounds = array<i64: 128, 128>}, {pipeline_mode = #tpu.pipeline_mode<synchronous>, transform_indices = @transform_8, window_bounds = array<i64: 1, 128>}, {transform_indices = @transform_9, window_bounds = array<i64: 8, 128>}]} {
    %c0 = arith.constant 0 : index
    %c0_0 = arith.constant 0 : index
    %0 = vector.load %arg1[%c0, %c0_0] : memref<8x64xf32, #tpu.memory_space<vmem>>, vector<8x64xf32>
    %1 = arith.truncf %0 : vector<8x64xf32> to vector<8x64xbf16>
    %c0_1 = arith.constant 0 : index
    %c0_2 = arith.constant 0 : index
    %2 = vector.load %arg2[%c0_1, %c0_2] : memref<64x256xbf16, #tpu.memory_space<vmem>>, vector<64x256xbf16>
    %cst = arith.constant dense<0.000000e+00> : vector<8x256xf32>
    %3 = tpu.matmul %1, %2, %cst {dimension_numbers = #tpu.dot_dimension_numbers<[1], [0], [0], [1], [0, 0, 1, 1], [], []>} : vector<8x64xbf16>, vector<64x256xbf16>, vector<8x256xf32> -> vector<8x256xf32>
    %c0_3 = arith.constant 0 : index
    %c0_4 = arith.constant 0 : index
    %4 = vector.load %arg3[%c0_3, %c0_4] : memref<1x256xf32, #tpu.memory_space<vmem>>, vector<1x256xf32>
    %5 = vector.broadcast %4 : vector<1x256xf32> to vector<8x256xf32>
    %6 = arith.addf %3, %5 : vector<8x256xf32>
    %cst_5 = arith.constant 0.000000e+00 : f32
    %7 = vector.broadcast %cst_5 : f32 to vector<8x256xf32>
    %8 = arith.maximumf %6, %7 : vector<8x256xf32>
    %9 = arith.truncf %8 : vector<8x256xf32> to vector<8x256xbf16>
    %c0_6 = arith.constant 0 : index
    %c0_7 = arith.constant 0 : index
    %10 = vector.load %arg4[%c0_6, %c0_7] : memref<256x256xbf16, #tpu.memory_space<vmem>>, vector<256x256xbf16>
    %cst_8 = arith.constant dense<0.000000e+00> : vector<8x256xf32>
    %11 = tpu.matmul %9, %10, %cst_8 {dimension_numbers = #tpu.dot_dimension_numbers<[1], [0], [0], [1], [0, 0, 1, 1], [], []>} : vector<8x256xbf16>, vector<256x256xbf16>, vector<8x256xf32> -> vector<8x256xf32>
    %c0_9 = arith.constant 0 : index
    %c0_10 = arith.constant 0 : index
    %12 = vector.load %arg5[%c0_9, %c0_10] : memref<1x256xf32, #tpu.memory_space<vmem>>, vector<1x256xf32>
    %13 = vector.broadcast %12 : vector<1x256xf32> to vector<8x256xf32>
    %14 = arith.addf %11, %13 : vector<8x256xf32>
    %cst_11 = arith.constant 0.000000e+00 : f32
    %15 = vector.broadcast %cst_11 : f32 to vector<8x256xf32>
    %16 = arith.maximumf %14, %15 : vector<8x256xf32>
    %17 = arith.extf %9 : vector<8x256xbf16> to vector<8x256xf32>
    %18 = arith.addf %16, %17 : vector<8x256xf32>
    %19 = arith.truncf %18 : vector<8x256xf32> to vector<8x256xbf16>
    %c0_12 = arith.constant 0 : index
    %c0_13 = arith.constant 0 : index
    %20 = vector.load %arg6[%c0_12, %c0_13] : memref<256x128xbf16, #tpu.memory_space<vmem>>, vector<256x128xbf16>
    %cst_14 = arith.constant dense<0.000000e+00> : vector<8x128xf32>
    %21 = tpu.matmul %19, %20, %cst_14 {dimension_numbers = #tpu.dot_dimension_numbers<[1], [0], [0], [1], [0, 0, 1, 1], [], []>} : vector<8x256xbf16>, vector<256x128xbf16>, vector<8x128xf32> -> vector<8x128xf32>
    %c0_15 = arith.constant 0 : index
    %c0_16 = arith.constant 0 : index
    %22 = vector.load %arg7[%c0_15, %c0_16] : memref<1x128xf32, #tpu.memory_space<vmem>>, vector<1x128xf32>
    %23 = vector.broadcast %22 : vector<1x128xf32> to vector<8x128xf32>
    %24 = arith.addf %21, %23 : vector<8x128xf32>
    %cst_17 = arith.constant 0.000000e+00 : f32
    %25 = vector.broadcast %cst_17 : f32 to vector<8x128xf32>
    %26 = arith.maximumf %24, %25 : vector<8x128xf32>
    %27 = arith.truncf %26 : vector<8x128xf32> to vector<8x128xbf16>
    %c0_18 = arith.constant 0 : index
    %c0_19 = arith.constant 0 : index
    %28 = vector.load %arg8[%c0_18, %c0_19] : memref<128x128xbf16, #tpu.memory_space<vmem>>, vector<128x128xbf16>
    %cst_20 = arith.constant dense<0.000000e+00> : vector<8x128xf32>
    %29 = tpu.matmul %27, %28, %cst_20 {dimension_numbers = #tpu.dot_dimension_numbers<[1], [0], [0], [1], [0, 0, 1, 1], [], []>} : vector<8x128xbf16>, vector<128x128xbf16>, vector<8x128xf32> -> vector<8x128xf32>
    %c0_21 = arith.constant 0 : index
    %c0_22 = arith.constant 0 : index
    %30 = vector.load %arg9[%c0_21, %c0_22] : memref<1x128xf32, #tpu.memory_space<vmem>>, vector<1x128xf32>
    %31 = vector.broadcast %30 : vector<1x128xf32> to vector<8x128xf32>
    %32 = arith.addf %29, %31 : vector<8x128xf32>
    %33 = arith.truncf %32 : vector<8x128xf32> to vector<8x128xbf16>
    %c0_23 = arith.constant 0 : index
    %c0_24 = arith.constant 0 : index
    %34 = vector.load %arg10[%c0_23, %c0_24] : memref<8x128xbf16, #tpu.memory_space<vmem>>, vector<8x128xbf16>
    tpu.vector_store %arg10[%c0_23, %c0_24], %33 {strides = array<i32>} : memref<8x128xbf16, #tpu.memory_space<vmem>>, vector<8x128xbf16>,
    return
  }
  func.func @transform_0(%arg0: i32) -> (i32, i32) {
    %c0_i32 = arith.constant 0 : i32
    %c0_i32_0 = arith.constant 0 : i32
    return %arg0, %c0_i32 : i32, i32
  }
  func.func @transform_1(%arg0: i32) -> (i32, i32) {
    %c0_i32 = arith.constant 0 : i32
    %c0_i32_0 = arith.constant 0 : i32
    %c0_i32_1 = arith.constant 0 : i32
    return %c0_i32, %c0_i32_0 : i32, i32
  }
  func.func @transform_2(%arg0: i32) -> (i32, i32) {
    %c0_i32 = arith.constant 0 : i32
    %c0_i32_0 = arith.constant 0 : i32
    %c0_i32_1 = arith.constant 0 : i32
    return %c0_i32, %c0_i32_0 : i32, i32
  }
  func.func @transform_3(%arg0: i32) -> (i32, i32) {
    %c0_i32 = arith.constant 0 : i32
    %c0_i32_0 = arith.constant 0 : i32
    %c0_i32_1 = arith.constant 0 : i32
    return %c0_i32, %c0_i32_0 : i32, i32
  }
  func.func @transform_4(%arg0: i32) -> (i32, i32) {
    %c0_i32 = arith.constant 0 : i32
    %c0_i32_0 = arith.constant 0 : i32
    %c0_i32_1 = arith.constant 0 : i32
    return %c0_i32, %c0_i32_0 : i32, i32
  }
  func.func @transform_5(%arg0: i32) -> (i32, i32) {
    %c0_i32 = arith.constant 0 : i32
    %c0_i32_0 = arith.constant 0 : i32
    %c0_i32_1 = arith.constant 0 : i32
    return %c0_i32, %c0_i32_0 : i32, i32
  }
  func.func @transform_6(%arg0: i32) -> (i32, i32) {
    %c0_i32 = arith.constant 0 : i32
    %c0_i32_0 = arith.constant 0 : i32
    %c0_i32_1 = arith.constant 0 : i32
    return %c0_i32, %c0_i32_0 : i32, i32
  }
  func.func @transform_7(%arg0: i32) -> (i32, i32) {
    %c0_i32 = arith.constant 0 : i32
    %c0_i32_0 = arith.constant 0 : i32
    %c0_i32_1 = arith.constant 0 : i32
    return %c0_i32, %c0_i32_0 : i32, i32
  }
  func.func @transform_8(%arg0: i32) -> (i32, i32) {
    %c0_i32 = arith.constant 0 : i32
    %c0_i32_0 = arith.constant 0 : i32
    %c0_i32_1 = arith.constant 0 : i32
    return %c0_i32, %c0_i32_0 : i32, i32
  }
  func.func @transform_9(%arg0: i32) -> (i32, i32) {
    %c0_i32 = arith.constant 0 : i32
    %c0_i32_0 = arith.constant 0 : i32
    return %arg0, %c0_i32 : i32, i32
  }
}

</mosaic_0001>

<bundles_post_ra>
// kernel: embedding_classifier_bn.1
= control target key start
LH: loop header
LB: loop body
LE: loop exit
PB: predicated region body
PF: predicated region fallthrough
CT: control target
= control target key end

     0   :  { %s1973_s0 = inlined_call_operand.hbm [shape: f32[13,64], index: 0, kind: input, shape index: {}]   ;;  %s1974_s1 = inlined_call_operand.hbm [shape: bf16[64,256], index: 1, kind: input, shape index: {}]   ;;  %s1975_s2 = inlined_call_operand.vmem [shape: f32[1,256], index: 2, kind: input, shape index: {}]   ;;  %s1976_s3 = inlined_call_operand.hbm [shape: bf16[256,256], index: 3, kind: input, shape index: {}]   ;;  %s1977_s4 = inlined_call_operand.vmem [shape: f32[1,256], index: 4, kind: input, shape index: {}]   ;;  %s1978_s5 = inlined_call_operand.hbm [shape: bf16[256,128], index: 5, kind: input, shape index: {}]   ;;  %s1979_s6 = inlined_call_operand.vmem [shape: f32[1,128], index: 6, kind: input, shape index: {}]   ;;  %s1980_s7 = inlined_call_operand.hbm [shape: bf16[128,128], index: 7, kind: input, shape index: {}]   ;;  %s1981_s8 = inlined_call_operand.vmem [shape: f32[1,128], index: 8, kind: input, shape index: {}]   ;;  %s1982_s9 = inlined_call_operand.vmem [shape: bf16[13,128], index: 9, kind: output, shape index: {}]  }
   0x1   :  { %1988 = sst [smem:[#allocation13_spill]] %s1982_s9 }
   0x2   :  { %14 = vsyncpa [#allocation3], 0 }
   0x3   :  { %16 = vsyncpa [#allocation3 + $0x1], 0 }
   0x4   :  { %17 = vsyncpa [#allocation5], 0 }
   0x5   :  { %18 = vsyncpa [#allocation8], 0  ;;  %s1719_s30 = smov 0   ;;  %s1721_s10 = smov 0  }
   0x6   :  { %s1723_s11 = smov 0   ;;  %s1725_s12 = smov 0  }
   0x7 LB: > { %s1657_s13 = smov [#allocation4]   ;;  %s1740_s15 = sadd.s32 4294967295, %s1655_s12   ;;  %s1655_s12 = sphi %s1725_s12, %s2007_s12   ;;  %s1651_s11 = sphi %s1723_s11, %s2006_s11   ;;  %s1647_s10 = sphi %s1721_s10, %s2005_s10   ;;  %s1643_s30 = sphi %s1719_s30, %s2004_s30  }
   0x8   : > { %s261_s14 = sshll.u32 %s1657_s13, 4  ;;  %p1165_p0 = scmp.ge.s32.totalorder %s1655_s12, 1  ;;  %s1745_s14 = int_to_ptr.vmem [resolvable:$true] %s261_s14 }
   0x9   : > { %p1984_p1 = scmp.eq.s32.totalorder %s1740_s15, 0  ;;  %p249_p2 = scmp.lt.s32.totalorder %s1655_s12, 3 }
   0xa   : > { %s1658_s17 = smov [#allocation7]   ;;  %s1659_s20 = smov [#allocation6]  }
   0xb   : > { %p1747_p3 = pnand %p1165_p0, %p249_p2  ;;  %s293_s18 = sshll.u32 %s1658_s17, 4  ;;  %s1759_s18 = int_to_ptr.vmem [resolvable:$true] %s293_s18 }
   0xc   : > { %s1761_s21 = sshll.u32 %s1659_s20, 4  ;;  %s1471_s24 = scalar_lea.hbm %s1974_s1, 1024  ;;  %s278_s21 = int_to_ptr.vmem [resolvable:$true] %s1761_s21 }
   0xd   : > { %s1989_s16 = scalar_select %p1747_p3, 1, 0 }
   0xe   : > { %p1318_p4 = pneg %p1747_p3  ;;  %p1472_p6 = scmp.ne.s32.totalorder %s1974_s1, %s1471_s24 }
   0xf   : > { %p1478_p10 = scmp.lt.u32.totalorder %s1471_s24, %s1974_s1 }
  0x10   : > { %p1755_p5 = pnand %p1318_p4, %p1984_p1 }
  0x12   : > { %p1771_p7 = pneg %p1755_p5 }
  0x14   : > { %p1474_p8 = pnand %p1771_p7, %p1472_p6 }
  0x16   : > { %p1475_p9 = pneg %p1474_p8 }
  0x18   : > { %p1480_p11 = pnand %p1478_p10, %p1475_p9 }
  0x1a   : > { %1483 = shalt.err (!%p1480_p11)
}
  0x1b   : > { %s1484_s13 = scalar_lea.vmem %s1745_s14, 1024  ;;  %p1492_p2 = scmp.lt.s32.totalorder %s1745_s14, %s1745_s14 }
  0x1c   : > { %p1485_p12 = scmp.ne.s32.totalorder %s1745_s14, %s1484_s13  ;;  %p1493_p4 = scmp.lt.s32.totalorder %s1484_s13, %s1484_s13 }
  0x1e   : > { %p1487_p13 = pnand %p1485_p12, %p1771_p7  ;;  %p1494_p6 = por %p1493_p4, %p1492_p2 }
  0x20   : > { %p1488_p0 = pneg %p1487_p13 }
  0x22   : > { %p1495_p8 = pnand %p1494_p6, %p1488_p0 }
  0x24   : > { %1498 = shalt.err (!%p1495_p8)
}
  0x25   : > { %s1983_s17 = smov 128   ;;  %s1661_s20 = smov 8  }
  0x26   : > { %1321 = dma.hbm_to_vmem [thread:$0]  (!%p1755_p5), %s1974_s1, 1024, %s1745_s14, [#allocation5], %s1983_s17, %s1983_s17, %s1661_s20  }
  0x27   : > { %s1499_s26 = scalar_lea.hbm %s1978_s5, 2048 }
  0x28   : > { %p1500_p9 = scmp.ne.s32.totalorder %s1978_s5, %s1499_s26  ;;  %p1506_p12 = scmp.lt.u32.totalorder %s1499_s26, %s1978_s5 }
  0x2a   : > { %p1502_p10 = pnand %p1500_p9, %p1771_p7 }
  0x2c   : > { %p1503_p11 = pneg %p1502_p10 }
  0x2e   : > { %p1508_p13 = pnand %p1506_p12, %p1503_p11 }
  0x30   : > { %1511 = shalt.err (!%p1508_p13)
}
  0x31   : > { %s1512_s14 = scalar_lea.vmem %s1759_s18, 2048  ;;  %p1520_p6 = scmp.lt.s32.totalorder %s1759_s18, %s1759_s18 }
  0x32   : > { %p1513_p0 = scmp.ne.s32.totalorder %s1759_s18, %s1512_s14  ;;  %p1521_p8 = scmp.lt.s32.totalorder %s1512_s14, %s1512_s14 }
  0x34   : > { %p1515_p2 = pnand %p1513_p0, %p1771_p7  ;;  %p1522_p9 = por %p1521_p8, %p1520_p6 }
  0x36   : > { %p1516_p4 = pneg %p1515_p2 }
  0x38   : > { %p1523_p10 = pnand %p1522_p9, %p1516_p4 }
  0x3a   : > { %1526 = shalt.err (!%p1523_p10)
}
  0x3b   : > { %s1986_s22 = smov 64   ;;  %s1987_s9 = smov 4  }
  0x3c   : > { %1327 = dma.hbm_to_vmem [thread:$0]  (!%p1755_p5), %s1978_s5, 2048, %s1759_s18, [#allocation8], %s1986_s22, %s1986_s22, %s1987_s9  }
  0x3d   : > { %s1527_s28 = scalar_lea.hbm %s1976_s3, 4096 }
  0x3e   : > { %p1528_p11 = scmp.ne.s32.totalorder %s1976_s3, %s1527_s28  ;;  %p1534_p0 = scmp.lt.u32.totalorder %s1527_s28, %s1976_s3 }
  0x40   : > { %p1530_p12 = pnand %p1528_p11, %p1771_p7 }
  0x42   : > { %p1531_p13 = pneg %p1530_p12 }
  0x44   : > { %p1536_p2 = pnand %p1534_p0, %p1531_p13 }
  0x46   : > { %1539 = shalt.err (!%p1536_p2)
}
  0x47   : > { %s1540_s23 = scalar_lea.vmem %s278_s21, 4096  ;;  %p1548_p9 = scmp.lt.s32.totalorder %s278_s21, %s278_s21 }
  0x48   : > { %p1541_p4 = scmp.ne.s32.totalorder %s278_s21, %s1540_s23  ;;  %p1549_p10 = scmp.lt.s32.totalorder %s1540_s23, %s1540_s23 }
  0x4a   : > { %p1543_p6 = pnand %p1541_p4, %p1771_p7  ;;  %p1550_p1 = por %p1549_p10, %p1548_p9 }
  0x4c   : > { %p1544_p8 = pneg %p1543_p6 }
  0x4e   : > { %p1551_p3 = pnand %p1550_p1, %p1544_p8 }
  0x50   : > { %1554 = shalt.err (!%p1551_p3)
}
  0x51   : > { %s1992_s18 = smov 128   ;;  %s1664_s25 = smov [#allocation9]  }
  0x52   : > { %1324 = dma.hbm_to_vmem [thread:$0]  (!%p1755_p5), %s1976_s3, 4096, %s278_s21, [#allocation5], %s1992_s18, %s1992_s18, %s1661_s20  }
  0x53   : > { %s309_s26 = sshll.u32 %s1664_s25, 4  ;;  %s1555_s13 = scalar_lea.hbm %s1980_s7, 1024  ;;  %s310_s26 = int_to_ptr.vmem [resolvable:$true] %s309_s26 }
  0x54   : > { %p1556_p1 = scmp.ne.s32.totalorder %s1980_s7, %s1555_s13  ;;  %p1562_p12 = scmp.lt.u32.totalorder %s1555_s13, %s1980_s7 }
  0x56   : > { %p1558_p3 = pnand %p1556_p1, %p1771_p7 }
  0x58   : > { %p1559_p11 = pneg %p1558_p3 }
  0x5a   : > { %p1564_p13 = pnand %p1562_p12, %p1559_p11 }
  0x5c   : > { %1567 = shalt.err (!%p1564_p13)
}
  0x5d   : > { %s1568_s21 = scalar_lea.vmem %s310_s26, 1024  ;;  %p1576_p6 = scmp.lt.s32.totalorder %s310_s26, %s310_s26 }
  0x5e   : > { %p1569_p0 = scmp.ne.s32.totalorder %s310_s26, %s1568_s21  ;;  %p1577_p8 = scmp.lt.s32.totalorder %s1568_s21, %s1568_s21 }
  0x60   : > { %p1571_p2 = pnand %p1569_p0, %p1771_p7  ;;  %p1578_p9 = por %p1577_p8, %p1576_p6 }
  0x62   : > { %p1572_p4 = pneg %p1571_p2 }
  0x64   : > { %p1579_p10 = pnand %p1578_p9, %p1572_p4 }
  0x66   : > { %1582 = shalt.err (!%p1579_p10)
}
  0x67   : > { %s1993_s20 = smov 4   ;;  %s1994_s18 = smov 64  }
  0x68   : > { %1330 = dma.hbm_to_vmem [thread:$0]  (!%p1755_p5), %s1980_s7, 1024, %s310_s26, [#allocation8], %s1994_s18, %s1994_s18, %s1993_s20  }
  0x69   : > { %s1865_s19 = sadd.s32 1, %s1655_s12   ;;  %s31_s27 = sadd.s32 1, %s1651_s11 }
  0x6a   : > { %s28_s17 = ssub.s32 %s1655_s12, %s1865_s19  ;;  %p38_p7 = scmp.ne.s32.totalorder %s1651_s11, %s1647_s10 }
  0x6b   : > { %p29_p1 = scmp.eq.s32.totalorder %s28_s17, 0  ;;  %p39_p3 = scmp.eq.s32.totalorder %s1655_s12, 0 }
  0x6c   : > { %p44_p11 = scmp.ne.s32.totalorder %s1647_s10, %s1643_s30  ;;  %p1339_p12 = scmp.lt.s32.totalorder %s1655_s12, 2 }
  0x6d   : > { %s1877_s24 = scalar_select %p29_p1, %s1651_s11, %s31_s27  }
  0x6e   : > { %p40_p13 = por %p39_p3, %p38_p7  ;;  %p1995_p0 = scmp.eq.s32.totalorder %s1740_s15, 0 }
  0x6f   : > { %s326_s28 = sand.u32 1, %s1651_s11   ;;  %s1172_s26 = sshll.u32 %s1655_s12, 7 }
  0x70   : > { %p1881_p2 = por %p1995_p0, %p44_p11  ;;  %s1171_s29 = sshll.u32 %s326_s28, 3 }
  0x71   : > { %s1890_s23 = scalar_lea.hbm %s1973_s0, %s1172_s26  ;;  %s330_s30 = scalar_lea.vmem [#allocation2], %s1171_s29 }
  0x72   : > { %s337_s21 = sshll.u32 %s330_s30, 4  ;;  %p1892_p5 = pnand %p1339_p12, %p40_p13  ;;  %s1896_s21 = int_to_ptr.vmem [resolvable:$true] %s337_s21 }
  0x73   : > { %s327_s12 = scalar_lea.sflag [#allocation3], %s326_s28  ;;  %s1583_s18 = scalar_lea.hbm %s1890_s23, 128 }
  0x74   : > { %p1584_p4 = scmp.ne.s32.totalorder %s1890_s23, %s1583_s18  ;;  %p1585_p6 = pneg %p1892_p5 }
  0x75   : > { %s1588_s27 = scalar_lea.hbm %s1973_s0, 256  ;;  %p1589_p10 = scmp.lt.u32.totalorder %s1890_s23, %s1973_s0 }
  0x76   : > { %p1586_p8 = pnand %p1585_p6, %p1584_p4  ;;  %p1590_p7 = scmp.lt.u32.totalorder %s1588_s27, %s1583_s18 }
  0x77   : > { %p1592_p3 = scmp.lt.u32.totalorder %s1583_s18, %s1890_s23 }
  0x78   : > { %p1587_p9 = pneg %p1586_p8  ;;  %p1591_p1 = por %p1590_p7, %p1589_p10 }
  0x7a   : > { %p1593_p11 = por %p1592_p3, %p1591_p1 }
  0x7c   : > { %p1594_p12 = pnand %p1593_p11, %p1587_p9 }
  0x7e   : > { %1597 = shalt.err (!%p1594_p12)
}
  0x7f   : > { %s1598_s28 = scalar_lea.vmem %s1896_s21, 128  ;;  %s1665_s29 = smov [#allocation2]  }
  0x80   : > { %p1599_p13 = scmp.ne.s32.totalorder %s1896_s21, %s1598_s28  ;;  %s1603_s13 = sshll.u32 %s1665_s29, 4  ;;  %s1604_s13 = int_to_ptr.vmem [resolvable:$false] %s1603_s13 }
  0x81   : > { %s1605_s14 = scalar_lea.vmem %s1604_s13, 256  ;;  %p1606_p8 = scmp.lt.s32.totalorder %s1896_s21, %s1604_s13 }
  0x82   : > { %p1601_p0 = pnand %p1599_p13, %p1585_p6  ;;  %p1607_p10 = scmp.lt.s32.totalorder %s1605_s14, %s1598_s28 }
  0x84   : > { %p1602_p4 = pneg %p1601_p0  ;;  %p1608_p7 = por %p1607_p10, %p1606_p8 }
  0x86   : > { %p1609_p1 = pnand %p1608_p7, %p1602_p4 }
  0x88   : > { %1612 = shalt.err (!%p1609_p1)
}
  0x89   : > { %1334 = dma.hbm_to_vmem [thread:$0]  (!%p1892_p5), %s1890_s23, 128, %s1896_s21, %s327_s12  }
  0x8a   : > { %p1998_p9 = scmp.ne.s32.totalorder %s1989_s16, 0 }
  0x8b   : > { %s348_s30 = sand.u32 (!%p1998_p9), 1, %s1647_s10  }
  0x8c   : > { %346 = sbr.rel (%p1998_p9) target bundleno = 1052 (0x41c), region = 56  ;;  %s1926_s18 = sshll.u32 (!%p1998_p9), %s348_s30, 3 }
  0x8d   : > { %s349_s22 = scalar_lea.sflag (!%p1998_p9), [#allocation3], %s348_s30  ;;  %s352_s9 = scalar_lea.vmem (!%p1998_p9), [#allocation2], %s1926_s18 }
  0x93   : > { %1630 = dma.done.wait (%p1881_p2), %s349_s22, 128  }
  0x94   : > { %1632 = vsyncadd (%p1881_p2), %s349_s22, 4294967168  ;;  %p1999_p6 = scmp.eq.s32.totalorder %s1740_s15, 0 }
  0x96   : > { %1634 = dma.done.wait (%p1999_p6), [#allocation5], 5120   ;;  %p2000_p5 = pmov %p1999_p6 }
  0x98   : > { %1636 = vsyncadd (%p2000_p5), [#allocation5], 4294962176  ;;  %p2001_p3 = pmov %p2000_p5 }
  0x9a   : > { %1638 = dma.done.wait (%p2001_p3), [#allocation8], 3072   ;;  %p2002_p11 = pmov %p2001_p3 }
  0x9b   : > { %v1666_v0 = vmov 0   ;;  %v1387_v1 = vld [vmem:[#allocation4 + $0x4] ss:$8 sps:$4 sm:$0xff]   ;;  %v1389_v2 = vld [vmem:[#allocation4] ss:$8 sps:$4 sm:$0xff]   ;;  %v407_v14 = vld [vmem:[%s352_s9] sm:$0xff]  ;;  %v419_v54 = vlaneseq }
  0x9c   : > { %1640 = vsyncadd (%p2002_p11), [#allocation8], 4294964224  ;;  %505 = vmatprep.mubr.bf16.mxu0 %v1666_v0  ;;  %473 = vmatprep.subr.bf16.mxu0 %v1387_v1  ;;  %v1390_v3 = vld [vmem:[#allocation4 + $0x14] ss:$8 sps:$4 sm:$0xff]   ;;  %v1392_v4 = vld [vmem:[#allocation4 + $0x10] ss:$8 sps:$4 sm:$0xff]   ;;  %v408_v16 = vpack.c.bf16 %v407_v14, %v407_v14 }
  0x9d   : > { %474 = vmatpush1.bf16.msra.mxu0 %v1389_v2  ;;  %v1393_v5 = vld [vmem:[#allocation4 + $0x24] ss:$8 sps:$4 sm:$0xff]   ;;  %v1395_v6 = vld [vmem:[#allocation4 + $0x20] ss:$8 sps:$4 sm:$0xff]   ;;  %v1402_v9 = vld [vmem:[#allocation6 + $0x14] ss:$8 sps:$4 sm:$0xff]  }
  0x9e   : > { %475 = vmatprep.subr.bf16.mxu0 %v1390_v3  ;;  %v1399_v7 = vld [vmem:[#allocation6 + $0x4] ss:$8 sps:$4 sm:$0xff]   ;;  %v1401_v8 = vld [vmem:[#allocation6] ss:$8 sps:$4 sm:$0xff]   ;;  %v1396_v10 = vld [vmem:[#allocation4 + $0x34] ss:$8 sps:$4 sm:$0xff]  }
  0x9f   : > { %722 = vmatprep.subr.bf16.mxu1 %v1399_v7  ;;  %v1404_v11 = vld [vmem:[#allocation6 + $0x10] ss:$8 sps:$4 sm:$0xff]   ;;  %v1405_v13 = vld [vmem:[#allocation6 + $0x24] ss:$8 sps:$4 sm:$0xff]   ;;  %v1407_v15 = vld [vmem:[#allocation6 + $0x20] ss:$8 sps:$4 sm:$0xff]  }
  0xa0   : > { %723 = vmatpush1.bf16.msra.mxu1 %v1401_v8  ;;  %v1398_v12 = vld [vmem:[#allocation4 + $0x30] ss:$8 sps:$4 sm:$0xff]   ;;  %v1408_v17 = vld [vmem:[#allocation6 + $0x34] ss:$8 sps:$4 sm:$0xff]   ;;  %vm469_vm0 = vcmask 523264   ;;  %v1447_v43 = vld [vmem:[#allocation7 + $0x40] sm:$0xff]  }
  0xa1   : > { %476 = vmatpush1.bf16.msra.mxu0 %v1392_v4  ;;  %724 = vmatprep.subr.bf16.mxu1 %v1402_v9  ;;  %v1410_v18 = vld [vmem:[#allocation6 + $0x30] ss:$8 sps:$4 sm:$0xff]   ;;  %v1411_v19 = vld [vmem:[#allocation6 + $0x44] ss:$8 sps:$4 sm:$0xff]   ;;  %v1413_v20 = vld [vmem:[#allocation6 + $0x40] ss:$8 sps:$4 sm:$0xff]  }
  0xa2   : > { %477 = vmatprep.subr.bf16.mxu0 %v1393_v5  ;;  %v1414_v21 = vld [vmem:[#allocation6 + $0x54] ss:$8 sps:$4 sm:$0xff]   ;;  %v1416_v22 = vld [vmem:[#allocation6 + $0x50] ss:$8 sps:$4 sm:$0xff]   ;;  %v1417_v23 = vld [vmem:[#allocation6 + $0x64] ss:$8 sps:$4 sm:$0xff]  }
  0xa3   : > { %v1419_v24 = vld [vmem:[#allocation6 + $0x60] ss:$8 sps:$4 sm:$0xff]   ;;  %v1420_v25 = vld [vmem:[#allocation6 + $0x74] ss:$8 sps:$4 sm:$0xff]   ;;  %v1422_v26 = vld [vmem:[#allocation6 + $0x70] ss:$8 sps:$4 sm:$0xff]  }
  0xa4   : > { %725 = vmatpush1.bf16.msra.mxu1 %v1404_v11  ;;  %v1423_v27 = vld [vmem:[#allocation6 + $0x84] ss:$8 sps:$4 sm:$0xff]   ;;  %v1425_v28 = vld [vmem:[#allocation6 + $0x80] ss:$8 sps:$4 sm:$0xff]   ;;  %v1426_v29 = vld [vmem:[#allocation6 + $0x94] ss:$8 sps:$4 sm:$0xff]  }
  0xa5   : > { %478 = vmatpush1.bf16.msra.mxu0 %v1395_v6  ;;  %726 = vmatprep.subr.bf16.mxu1 %v1405_v13  ;;  %v1428_v30 = vld [vmem:[#allocation6 + $0x90] ss:$8 sps:$4 sm:$0xff]   ;;  %v1429_v31 = vld [vmem:[#allocation6 + $0xa4] ss:$8 sps:$4 sm:$0xff]   ;;  %v1431_v32 = vld [vmem:[#allocation6 + $0xa0] ss:$8 sps:$4 sm:$0xff]  }
  0xa6   : > { %479 = vmatprep.subr.bf16.mxu0 %v1396_v10  ;;  %v1432_v33 = vld [vmem:[#allocation6 + $0xb4] ss:$8 sps:$4 sm:$0xff]   ;;  %v1434_v34 = vld [vmem:[#allocation6 + $0xb0] ss:$8 sps:$4 sm:$0xff]   ;;  %v1435_v35 = vld [vmem:[#allocation6 + $0xc4] ss:$8 sps:$4 sm:$0xff]  }
  0xa7   : > { %v1437_v36 = vld [vmem:[#allocation6 + $0xc0] ss:$8 sps:$4 sm:$0xff]   ;;  %v1438_v37 = vld [vmem:[#allocation6 + $0xd4] ss:$8 sps:$4 sm:$0xff]   ;;  %v1440_v38 = vld [vmem:[#allocation6 + $0xd0] ss:$8 sps:$4 sm:$0xff]  }
  0xa8   : > { %727 = vmatpush1.bf16.msra.mxu1 %v1407_v15  ;;  %v1441_v39 = vld [vmem:[#allocation6 + $0xe4] ss:$8 sps:$4 sm:$0xff]   ;;  %v1443_v40 = vld [vmem:[#allocation6 + $0xe0] ss:$8 sps:$4 sm:$0xff]   ;;  %v1444_v41 = vld [vmem:[#allocation6 + $0xf4] ss:$8 sps:$4 sm:$0xff]  }
  0xa9   : > { %480 = vmatpush1.bf16.msra.mxu0 %v1398_v12  ;;  %728 = vmatprep.subr.bf16.mxu1 %v1408_v17  ;;  %v1446_v42 = vld [vmem:[#allocation6 + $0xf0] ss:$8 sps:$4 sm:$0xff]   ;;  %v1448_v44 = vld [vmem:[#allocation7] sm:$0xff]   ;;  %v1449_v45 = vld [vmem:[#allocation7 + $0x48] sm:$0xff]   ;;  %v420_v55 = vshrl.u32 %v419_v54, 7  ;;  %v1667_v12 = vmov 0.0  }
  0xaa   : > { %1249 = vmatprep.subr.bf16.mxu0 %v1447_v43  ;;  %v1450_v46 = vld [vmem:[#allocation7 + $0x8] sm:$0xff]   ;;  %v1451_v47 = vld [vmem:[#allocation7 + $0x50] sm:$0xff]   ;;  %v1453_v49 = vld [vmem:[#allocation7 + $0x58] sm:$0xff]   ;;  %vm1668_vm1 = vmmov 0   ;;  %p402_p2 = scmp.lt.s32.totalorder %s1740_s15, 1  ;;  %s2003_s13 = sld [smem:[#allocation13_spill]] }
  0xab   : > { %v1452_v48 = vld [vmem:[#allocation7 + $0x10] sm:$0xff]   ;;  %v1454_v50 = vld [vmem:[#allocation7 + $0x18] sm:$0xff]   ;;  %v1455_v51 = vld [vmem:[#allocation7 + $0x60] sm:$0xff]   ;;  %v421_v56 = vsub.s32 0, %v420_v55  ;;  %v425_v58 = vsub.s32 1, %v420_v55 }
  0xac   : > { %1188 = vmatmul.mubr.msk.bf16.vlgmr.msra.gmra.mrb[0].mxu0 %vm469_vm0, %v408_v16  ;;  %729 = vmatpush1.bf16.msra.mxu1 %v1410_v18  ;;  %v1456_v52 = vld [vmem:[#allocation7 + $0x20] sm:$0xff]   ;;  %v1457_v53 = vld [vmem:[#allocation7 + $0x68] sm:$0xff]   ;;  %v1459_v8 = vld [vmem:[#allocation7 + $0x70] sm:$0xff]   ;;  %s2009_s15 = smov (!%p402_p2, %s1740_s15), 1 }
  0xad   : > { %730 = vmatprep.subr.bf16.mxu1 %v1411_v19  ;;  %1250 = vmatpush3.bf16.msra.mxu0 %v1448_v44  ;;  %v417_v57 = vld [vmem:[%s1975_s2] sm:$0x3]  ;;  %v1460_v9 = vld [vmem:[#allocation7 + $0x30] sm:$0xff]   ;;  %v1461_v10 = vld [vmem:[#allocation7 + $0x78] sm:$0xff]   ;;  %s1179_s26 = sshll.u32 %s2009_s15, 2 }
  0xae   : > { %1251 = vmatprep.subr.bf16.mxu0 %v1449_v45  ;;  %v422_v59 = vrot.slane %v417_v57, %v421_v56  ;;  %v426_v60 = vrot.slane %v417_v57, %v425_v58  ;;  %v1458_v7 = vld [vmem:[#allocation7 + $0x28] sm:$0xff]   ;;  %v1462_v11 = vld [vmem:[#allocation7 + $0x38] sm:$0xff]  }
  0xaf   : > { %v550_v13 = vld [vmem:[%s1977_s4] sm:$0x3] }
  0xb0   : > { %731 = vmatpush1.bf16.msra.mxu1 %v1413_v20  ;;  %v555_v14 = vrot.slane %v550_v13, %v421_v56  ;;  %v559_v15 = vrot.slane %v550_v13, %v425_v58  ;;  %s405_s14 = scalar_lea.vmem %s2003_s13, %s1179_s26 }
  0xb1   : > { %732 = vmatprep.subr.bf16.mxu1 %v1414_v21  ;;  %1252 = vmatpush3.bf16.msra.mxu0 %v1450_v46 }
  0xb2   : > { %1253 = vmatprep.subr.bf16.mxu0 %v1451_v47  ;;  %v1238_v47 = vld [vmem:[%s1981_s8] ss:$0 sm:$0xff] }
  0xb4   : > { %733 = vmatpush1.bf16.msra.mxu1 %v1416_v22 }
  0xb5   : > { %734 = vmatprep.subr.bf16.mxu1 %v1417_v23  ;;  %1254 = vmatpush3.bf16.msra.mxu0 %v1452_v48 }
  0xb6   : > { %1255 = vmatprep.subr.bf16.mxu0 %v1453_v49 }
  0xb8   : > { %735 = vmatpush1.bf16.msra.mxu1 %v1419_v24 }
  0xb9   : > { %736 = vmatprep.subr.bf16.mxu1 %v1420_v25  ;;  %1256 = vmatpush3.bf16.msra.mxu0 %v1454_v50 }
  0xba   : > { %1257 = vmatprep.subr.bf16.mxu0 %v1455_v51 }
  0xbc   : > { %737 = vmatpush1.bf16.msra.mxu1 %v1422_v26 }
  0xbd   : > { %738 = vmatprep.subr.bf16.mxu1 %v1423_v27  ;;  %1258 = vmatpush3.bf16.msra.mxu0 %v1456_v52 }
  0xbe   : > { %1259 = vmatprep.subr.bf16.mxu0 %v1457_v53 }
  0xc0   : > { %739 = vmatpush1.bf16.msra.mxu1 %v1425_v28 }
  0xc1   : > { %740 = vmatprep.subr.bf16.mxu1 %v1426_v29  ;;  %1260 = vmatpush3.bf16.msra.mxu0 %v1458_v7  ;;  %v1463_v29 = vld [vmem:[#allocation9] sm:$0xff]  }
  0xc2   : > { %1261 = vmatprep.subr.bf16.mxu0 %v1459_v8 }
  0xc4   : > { %741 = vmatpush1.bf16.msra.mxu1 %v1428_v30 }
  0xc5   : > { %742 = vmatprep.subr.bf16.mxu1 %v1429_v31  ;;  %1262 = vmatpush3.bf16.msra.mxu0 %v1460_v9  ;;  %v1464_v31 = vld [vmem:[#allocation9 + $0x8] sm:$0xff]  }
  0xc6   : > { %1263 = vmatprep.subr.bf16.mxu0 %v1461_v10 }
  0xc8   : > { %743 = vmatpush1.bf16.msra.mxu1 %v1431_v32  ;;  %v1465_v32 = vld [vmem:[#allocation9 + $0x10] sm:$0xff]  }
  0xc9   : > { %744 = vmatprep.subr.bf16.mxu1 %v1432_v33  ;;  %1264 = vmatpush3.bf16.msra.mxu0 %v1462_v11  ;;  %v1466_v33 = vld [vmem:[#allocation9 + $0x18] sm:$0xff]  }
  0xca   : > { %1280 = vmatprep.subr.bf16.mxu0 %v1667_v12 }
  0xcc   : > { %745 = vmatpush1.bf16.msra.mxu1 %v1434_v34  ;;  %v1467_v34 = vld [vmem:[#allocation9 + $0x20] sm:$0xff]  }
  0xcd   : > { %746 = vmatprep.subr.bf16.mxu1 %v1435_v35  ;;  %v1468_v35 = vld [vmem:[#allocation9 + $0x28] sm:$0xff]  }
  0xd0   : > { %747 = vmatpush1.bf16.msra.mxu1 %v1437_v36  ;;  %v1469_v36 = vld [vmem:[#allocation9 + $0x30] sm:$0xff]  }
  0xd1   : > { %748 = vmatprep.subr.bf16.mxu1 %v1438_v37  ;;  %v1470_v37 = vld [vmem:[#allocation9 + $0x38] sm:$0xff]  }
  0xd4   : > { %749 = vmatpush1.bf16.msra.mxu1 %v1440_v38 }
  0xd5   : > { %750 = vmatprep.subr.bf16.mxu1 %v1441_v39  ;;  %v1221_v39 = vld [vmem:[%s1979_s6] ss:$0 sm:$0xff] }
  0xd8   : > { %751 = vmatpush1.bf16.msra.mxu1 %v1443_v40 }
  0xd9   : > { %752 = vmatprep.subr.bf16.mxu1 %v1444_v41 }
  0xdc   : > { %753 = vmatpush1.bf16.msra.mxu1 %v1446_v42 }
 0x17f   : > { %v507_v61 = vpop.f32.mrb[0].mxu0 }
 0x180   : > { %v508_v62 = vadd.f32 %v507_v61, %v422_v59  ;;  %v509_v63 = vpop.f32.mrb[1].mxu0 }
 0x181   : > { %v510_v0 = vadd.f32 %v509_v63, %v426_v60  ;;  %v511_v1 = vpop.f32.mrb[2].mxu0 }
 0x182   : > { %v514_v2 = vmax.f32 %v508_v62, 0.0  ;;  %v512_v3 = vpop.f32.mrb[3].mxu0 }
 0x183   : > { %v515_v4 = vmax.f32 %v510_v0, 0.0 }
 0x184   : > { %v516_v6 = vpack.c.bf16 %v514_v2, %v514_v2 }
 0x185   : > { %v517_v5 = vpack.c.bf16 %v515_v4, %v515_v4 }
 0x186   : > { %v765_v21 = vunpack.c.l.bf16 %v516_v6 }
 0x187   : > { %754 = vmatprep.mubr.bf16.mxu1 %v517_v5  ;;  %v766_v24 = vunpack.c.l.bf16 %v517_v5 }
 0x188   : > { %755 = vmatmul.mubr.bf16.vlgmr.msra.gmra.mrb[0].mxu1 %v516_v6 }
 0x25b   : > { %v756_v16 = vpop.f32.mrb[0].mxu1 }
 0x25c   : > { %v757_v17 = vadd.f32 %v756_v16, %v555_v14  ;;  %v758_v18 = vpop.f32.mrb[1].mxu1 }
 0x25d   : > { %v759_v19 = vadd.f32 %v758_v18, %v559_v15  ;;  %v760_v20 = vpop.f32.mrb[2].mxu1 }
 0x25e   : > { %v763_v22 = vmax.f32 %v757_v17, 0.0  ;;  %v761_v23 = vpop.f32.mrb[3].mxu1 }
 0x25f   : > { %v764_v25 = vmax.f32 %v759_v19, 0.0 }
 0x260   : > { %v767_v26 = vadd.f32 %v765_v21, %v763_v22 }
 0x261   : > { %v768_v27 = vadd.f32 %v766_v24, %v764_v25 }
 0x262   : > { %v769_v30 = vpack.c.bf16 %v767_v26, %v767_v26 }
 0x263   : > { %v770_v28 = vpack.c.bf16 %v768_v27, %v768_v27 }
 0x265   : > { %938 = vmatprep.mubr.bf16.mxu0 %v770_v28 }
 0x266   : > { %939 = vmatmul.mubr.bf16.vlgmr.msra.gmra.mrb[4].mxu0 %v769_v30 }
 0x267   : > { %1281 = vmatpush3.bf16.msra.mxu0 %v1463_v29  ;;  %1296 = vmatprep.mubr.msk.bf16.mxu0 %vm1668_vm1, %v1667_v12 }
 0x268   : > { %1282 = vmatprep.subr.bf16.mxu0 %v1667_v12 }
 0x26b   : > { %1283 = vmatpush3.bf16.msra.mxu0 %v1464_v31 }
 0x26c   : > { %1284 = vmatprep.subr.bf16.mxu0 %v1667_v12 }
 0x26f   : > { %1285 = vmatpush3.bf16.msra.mxu0 %v1465_v32 }
 0x270   : > { %1286 = vmatprep.subr.bf16.mxu0 %v1667_v12 }
 0x273   : > { %1287 = vmatpush3.bf16.msra.mxu0 %v1466_v33 }
 0x274   : > { %1288 = vmatprep.subr.bf16.mxu0 %v1667_v12 }
 0x277   : > { %1289 = vmatpush3.bf16.msra.mxu0 %v1467_v34 }
 0x278   : > { %1290 = vmatprep.subr.bf16.mxu0 %v1667_v12 }
 0x27b   : > { %1291 = vmatpush3.bf16.msra.mxu0 %v1468_v35 }
 0x27c   : > { %1292 = vmatprep.subr.bf16.mxu0 %v1667_v12 }
 0x27f   : > { %1293 = vmatpush3.bf16.msra.mxu0 %v1469_v36 }
 0x280   : > { %1294 = vmatprep.subr.bf16.mxu0 %v1667_v12 }
 0x283   : > { %1295 = vmatpush3.bf16.msra.mxu0 %v1470_v37 }
 0x339   : > { %v1265_v38 = vpop.f32.mrb[4].mxu0 }
 0x33a   : > { %v1266_v40 = vpop.f32.mrb[5].mxu0 }
 0x33b   : > { %v1267_v41 = vadd.f32 %v1266_v40, %v1265_v38  ;;  %v1268_v42 = vpop.f32.mrb[6].mxu0 }
 0x33c   : > { %v1269_v43 = vpop.f32.mrb[7].mxu0 }
 0x33d   : > { %v941_v44 = vadd.f32 %v1267_v41, %v1221_v39 }
 0x33f   : > { %v946_v45 = vmax.f32 %v941_v44, 0.0 }
 0x341   : > { %v947_v46 = vpack.c.bf16 %v946_v45, %v946_v45 }
 0x343   : > { %1297 = vmatmul.mubr.bf16.vlgmr.msra.gmra.mrb[8].mxu0 %v947_v46 }
 0x416   : > { %v1053_v48 = vpop.f32.mrb[8].mxu0 }
 0x417   : > { %v1054_v49 = vadd.f32 %v1238_v47, %v1053_v48  ;;  %v1298_v50 = vpop.f32.mrb[9].mxu0 }
 0x418   : > { %v1056_v51 = vpop.f32.mrb[10].mxu0 }
 0x419   : > { %v1059_v52 = vpack.c.bf16 %v1054_v49, %v1054_v49  ;;  %v1299_v53 = vpop.f32.mrb[11].mxu0 }
 0x41b   : > { %1060 = vst [vmem:[%s405_s14] sm:$0xf] %v1059_v52 }
 0x41c PF: > { %p21_p12 = scmp.ge.s32.totalorder %s1865_s19, 4   ;;  %s2004_s30 = smov %s1647_s10 }
 0x41d   : > { %s2005_s10 = smov %s1651_s11  ;;  %s2006_s11 = smov %s1877_s24 }
 0x41e   : > { %s2007_s12 = smov %s1865_s19  ;;  %23 = sbr.rel (!%p21_p12) target bundleno = 7 (0x7), region = 112 }
 0x425   :  { %1080 = vsyncpa [#allocation3], 1 }
 0x426   :  { %1082 = vsyncpa [#allocation3 + $0x1], 1 }
 0x427   :  { %1083 = vsyncpa [#allocation5], 1 }
 0x428   :  { %1084 = vsyncpa [#allocation8], 1 }

</bundles_post_ra>
